<compile_context>
chip_gen: v6e
topology: v6e:2x2x1
jax: 0.10.0
libtpu: 0.0.40
codegen_flags: <defaults>
</compile_context>

<pallas_src>
import jax
import jax.numpy as jnp
from jax.experimental import pallas as pl
from jax.experimental.pallas import tpu as pltpu

_MIB = 2 ** 20
_TM_CANDIDATES = (4096, 2048, 1024, 512, 256, 128, 64, 32, 16, 8)
_TN_CANDIDATES = (512, 256, 128)


def _v_proj_kernel_bias(x_ref, w_ref, b_ref, o_ref):
    # x_ref: (btm, C) token rows; w_ref: (btn|C, C) weight rows in PyTorch
    # layout (y = x @ W^T).  Contract the shared last dim on the MXU
    # (native transposed-RHS matmul), accumulate in f32, fuse bias.
    acc = jax.lax.dot_general(
        x_ref[...], w_ref[...],
        dimension_numbers=(((1,), (1,)), ((), ())),
        preferred_element_type=jnp.float32)
    o_ref[...] = (acc + b_ref[...].astype(jnp.float32)).astype(o_ref.dtype)


def _v_proj_kernel_nobias(x_ref, w_ref, o_ref):
    acc = jax.lax.dot_general(
        x_ref[...], w_ref[...],
        dimension_numbers=(((1,), (1,)), ((), ())),
        preferred_element_type=jnp.float32)
    o_ref[...] = acc.astype(o_ref.dtype)


def _vmem_capacity_bytes():
    """Per-core VMEM capacity; conservative 64 MiB (v7x) fallback."""
    try:
        cap = int(getattr(pltpu.get_tpu_info(), "vmem_capacity_bytes", 0))
        if cap > 0:
            return cap
    except Exception:
        pass
    return 64 * _MIB


def _plan_tiles(M, C, in_isz, out_isz, budget, max_tm):
    """Pick a grid plan that fits the per-generation VMEM budget.

    Returns ("resident", btm, C,  need)  -- full (C, C) weight kept in VMEM, or
            ("tiled",    btm, btn, need) -- Cout tiled (innermost); activation
                                             block resident across inner loop.
    All byte counts are itemsize-aware and already include 2x double-buffering.
    """
    tms = [t for t in _TM_CANDIDATES if t <= max_tm] or [8]
    bias_bytes = 2 * C * 4

    # Plan A: weight fully resident, 1-D grid over M tiles only.
    w_bytes = 2 * C * C * in_isz               # conservative: double-buffered
    for tm in tms:
        btm = M if M <= tm else tm
        need = w_bytes + 2 * btm * C * (in_isz + out_isz) + bias_bytes
        if need <= budget:
            return "resident", btm, C, need

    # Plan B: weight too large -- tile Cout (inner axis); only the small
    # weight stripe is re-streamed, activations are read once.
    for tn in _TN_CANDIDATES:
        btn = C if C <= tn else tn
        for tm in tms:
            btm = M if M <= tm else tm
            need = (2 * btm * C * in_isz + 2 * btn * C * in_isz
                    + 2 * btm * btn * out_isz + bias_bytes)
            if need <= budget:
                return "tiled", btm, btn, need

    # TODO(synk): add a K (C_in) grid axis with an f32 VMEM accumulator scratch
    # (pl.when init/store) for extreme C where a (btm, C) stripe overflows VMEM.
    btm = min(M, 8)
    btn = min(C, 128)
    need = (2 * btm * C * in_isz + 2 * btn * C * in_isz
            + 2 * btm * btn * out_isz + bias_bytes)
    return "tiled", btm, btn, need


def vattention_forward(x, weight, num_heads, bias=None, *,
                       compute_dtype=None, max_tm=4096):
    """Evo-ViT VAttention forward.

    x:      (B, N, C)
    weight: (C, C)   nn.Linear weight in PyTorch layout (y = x @ weight.T)
    bias:   optional (C,) nn.Linear bias (qkv_bias=True)
    Returns (B, num_heads, N, C // num_heads), dtype of x.

    Note: for tiny problem sizes (e.g. the module's dim=32 unit test) the
    kernel degenerates to a single-block call; in production such shapes are
    better served by a plain XLA einsum.
    """
    B, N, C = x.shape
    head_dim = C // num_heads
    M = B * N
    out_dtype = x.dtype

    if compute_dtype is not None and x.dtype != compute_dtype:
        # Opt-in: a no-op if the model already runs in bf16; for f32 models it
        # costs one extra HBM pass of x, so it is not forced on by default.
        x = x.astype(compute_dtype)
        weight = weight.astype(compute_dtype)

    x2d = x.reshape(M, C)
    in_isz = jnp.dtype(x2d.dtype).itemsize
    out_isz = jnp.dtype(out_dtype).itemsize

    cap = _vmem_capacity_bytes()
    budget = int(0.75 * cap)        # ~96 MiB on 128 MiB parts, ~48 MiB on v7x
    plan, btm, btn, need = _plan_tiles(M, C, in_isz, out_isz, budget, max_tm)

    # `need` already includes double-buffering; add fixed headroom only and
    # never exceed the physical per-core VMEM.
    vmem_limit = int(min(int(0.9 * cap), max(need + 8 * _MIB, 32 * _MIB)))

    with_bias = bias is not None
    cost = pl.CostEstimate(
        flops=2 * M * C * C,
        transcendentals=0,
        bytes_accessed=(M * C + C * C) * in_isz
        + (C * 4 if with_bias else 0)
        + M * C * out_isz,
    )

    kernel = _v_proj_kernel_bias if with_bias else _v_proj_kernel_nobias
    args = [x2d, weight]
    if with_bias:
        args.append(bias.reshape(1, C).astype(jnp.float32))

    if plan == "resident":
        # 1-D grid over token-row tiles; weight block index is constant so it
        # is DMA'd once; activations stream from HBM exactly once.
        grid = (pl.cdiv(M, btm),)
        in_specs = [pl.BlockSpec((btm, C), lambda i: (i, 0)),
                    pl.BlockSpec((C, C), lambda i: (0, 0))]
        if with_bias:
            in_specs.append(pl.BlockSpec((1, C), lambda i: (0, 0)))
        out_specs = pl.BlockSpec((btm, C), lambda i: (i, 0))
        dims = ("parallel",)          # megacore shards the long M axis
    else:
        # Cout innermost: the large (btm, C) activation block index is
        # unchanged across the inner loop (no re-streaming of activations);
        # M outermost so both v7x TensorCores get balanced work.
        grid = (pl.cdiv(M, btm), pl.cdiv(C, btn))
        in_specs = [pl.BlockSpec((btm, C), lambda i, j: (i, 0)),
                    pl.BlockSpec((btn, C), lambda i, j: (j, 0))]
        if with_bias:
            in_specs.append(pl.BlockSpec((1, btn), lambda i, j: (0, j)))
        out_specs = pl.BlockSpec((btm, btn), lambda i, j: (i, j))
        dims = ("parallel", "arbitrary")

    y2d = pl.pallas_call(
        kernel,
        out_shape=jax.ShapeDtypeStruct((M, C), out_dtype),
        grid_spec=pltpu.PrefetchScalarGridSpec(
            num_scalar_prefetch=0,
            grid=grid,
            in_specs=in_specs,
            out_specs=out_specs,
        ),
        compiler_params=pltpu.CompilerParams(
            dimension_semantics=dims,
            vmem_limit_bytes=vmem_limit,
        ),
        cost_estimate=cost,
    )(*args)

    # reshape(B, N, 1, H, Dh).permute(2,0,3,1,4)[0]  ==  (B, H, N, Dh).
    # Done outside the kernel so stores stay lane-dense (C on the lane axis);
    # XLA fuses this layout change into the downstream consumer.
    return y2d.reshape(B, N, num_heads, head_dim).transpose(0, 2, 1, 3)


def vattention_reference(x, weight, num_heads, bias=None):
    B, N, C = x.shape
    head_dim = C // num_heads
    y = jnp.einsum("bnc,dc->bnd", x, weight)
    if bias is not None:
        y = y + bias
    v = y.reshape(B, N, 1, num_heads, head_dim).transpose(2, 0, 3, 1, 4)
    return v[0]


if __name__ == "__main__":
    # Shapes consistent with the module: dim=32, num_heads=8 -> head_dim=4.
    num_heads = 8
    B, N, C = 2, 8, 32

    key = jax.random.PRNGKey(0)
    kx, kw, kb = jax.random.split(key, 3)
    x = jax.random.normal(kx, (B, N, C), dtype=jnp.float32)
    weight = jax.random.normal(kw, (C, C), dtype=jnp.float32) * (C ** -0.5)
    bias = jax.random.normal(kb, (C,), dtype=jnp.float32) * 0.1

    # Default qkv_bias=False path.
    out = jax.block_until_ready(vattention_forward(x, weight, num_heads))
    ref = vattention_reference(x, weight, num_heads)
    assert out.shape == (B, num_heads, N, C // num_heads), out.shape
    assert jnp.allclose(out, ref, atol=1e-5, rtol=1e-5), "mismatch (no bias)"

    # qkv_bias=True path (bias fused in the kernel epilogue).
    out_b = jax.block_until_ready(
        vattention_forward(x, weight, num_heads, bias=bias))
    ref_b = vattention_reference(x, weight, num_heads, bias=bias)
    assert jnp.allclose(out_b, ref_b, atol=1e-5, rtol=1e-5), "mismatch (bias)"

    # Multi-tile path (small max_tm forces grid > 1) and bf16 compute path.
    B2, N2, C2, H2 = 2, 128, 192, 3
    kx2, kw2, kb2 = jax.random.split(jax.random.PRNGKey(1), 3)
    x2 = jax.random.normal(kx2, (B2, N2, C2), dtype=jnp.float32)
    w2 = jax.random.normal(kw2, (C2, C2), dtype=jnp.float32) * (C2 ** -0.5)
    b2 = jax.random.normal(kb2, (C2,), dtype=jnp.float32) * 0.1
    ref2 = vattention_reference(x2, w2, H2, bias=b2)

    out2 = jax.block_until_ready(
        vattention_forward(x2, w2, H2, bias=b2, max_tm=64))
    assert jnp.allclose(out2, ref2, atol=1e-5, rtol=1e-5), "mismatch (tiled f32)"

    out2_bf16 = jax.block_until_ready(
        vattention_forward(x2, w2, H2, bias=b2, compute_dtype=jnp.bfloat16))
    assert jnp.allclose(out2_bf16, ref2, atol=5e-2, rtol=5e-2), "mismatch (bf16)"

    print("KERNEL_OK")
</pallas_src>

<mosaic_0001>
module attributes {stable_mosaic.version = 11 : i64} {
  func.func @_v_proj_kernel_nobias(%arg0: i32, %arg1: memref<16x32xf32, #tpu.memory_space<vmem>>, %arg2: memref<32x32xf32, #tpu.memory_space<vmem>>, %arg3: memref<16x32xf32, #tpu.memory_space<vmem>>) attributes {dimension_semantics = [#tpu.dimension_semantics<parallel>], iteration_bounds = array<i64: 1>, scalar_prefetch = 0 : i64, scratch_operands = 0 : i64, tpu.core_type = #tpu.core_type<tc>, window_params = [{transform_indices = @transform_0, window_bounds = array<i64: 16, 32>}, {pipeline_mode = #tpu.pipeline_mode<synchronous>, transform_indices = @transform_1, window_bounds = array<i64: 32, 32>}, {transform_indices = @transform_2, window_bounds = array<i64: 16, 32>}]} {
    %c0 = arith.constant 0 : index
    %c0_0 = arith.constant 0 : index
    %0 = vector.load %arg1[%c0, %c0_0] : memref<16x32xf32, #tpu.memory_space<vmem>>, vector<16x32xf32>
    %c0_1 = arith.constant 0 : index
    %c0_2 = arith.constant 0 : index
    %1 = vector.load %arg2[%c0_1, %c0_2] : memref<32x32xf32, #tpu.memory_space<vmem>>, vector<32x32xf32>
    %cst = arith.constant dense<0.000000e+00> : vector<16x32xf32>
    %2 = tpu.matmul %0, %1, %cst {dimension_numbers = #tpu.dot_dimension_numbers<[1], [1], [0], [0], [0, 0, 1, 0], [], []>} : vector<16x32xf32>, vector<32x32xf32>, vector<16x32xf32> -> vector<16x32xf32>
    %c0_3 = arith.constant 0 : index
    %c0_4 = arith.constant 0 : index
    %3 = vector.load %arg3[%c0_3, %c0_4] : memref<16x32xf32, #tpu.memory_space<vmem>>, vector<16x32xf32>
    tpu.vector_store %arg3[%c0_3, %c0_4], %2 {strides = array<i32>} : memref<16x32xf32, #tpu.memory_space<vmem>>, vector<16x32xf32>,
    return
  }
  func.func @transform_0(%arg0: i32) -> (i32, i32) {
    %c0_i32 = arith.constant 0 : i32
    %c0_i32_0 = arith.constant 0 : i32
    return %arg0, %c0_i32 : i32, i32
  }
  func.func @transform_1(%arg0: i32) -> (i32, i32) {
    %c0_i32 = arith.constant 0 : i32
    %c0_i32_0 = arith.constant 0 : i32
    %c0_i32_1 = arith.constant 0 : i32
    return %c0_i32, %c0_i32_0 : i32, i32
  }
  func.func @transform_2(%arg0: i32) -> (i32, i32) {
    %c0_i32 = arith.constant 0 : i32
    %c0_i32_0 = arith.constant 0 : i32
    return %arg0, %c0_i32 : i32, i32
  }
}

</mosaic_0001>

<bundles_post_ra>
// kernel: tpu_custom_call.1
= control target key start
LH: loop header
LB: loop body
LE: loop exit
PB: predicated region body
PF: predicated region fallthrough
CT: control target
= control target key end

     0   :  { %7 = vsyncpa [#allocation3], 0  ;;  %s304_s0 = inlined_call_operand.hbm [shape: f32[16,32], index: 0, kind: input, shape index: {}]   ;;  %s305_s1 = inlined_call_operand.hbm [shape: f32[32,32], index: 1, kind: input, shape index: {}]   ;;  %s306_s2 = inlined_call_operand.hbm [shape: f32[16,32], index: 2, kind: output, shape index: {}]  }
   0x1   :  { %8 = vsyncpa [#allocation6], 0 }
   0x2   :  { %9 = vsyncpa [#allocation4], 0  ;;  %s254_s9 = smov [#allocation2]  }
   0x3   :  { %s15_s10 = sshll.u32 %s254_s9, 4  ;;  %s16_s10 = int_to_ptr.vmem [resolvable:$true] %s15_s10 }
   0x4   :  { %s196_s11 = scalar_lea.vmem %s16_s10, 256  ;;  %p201_p1 = scmp.lt.s32.totalorder %s16_s10, %s16_s10 }
   0x5   :  { %p197_p0 = scmp.ne.s32.totalorder %s16_s10, %s196_s11  ;;  %p202_p2 = scmp.lt.s32.totalorder %s196_s11, %s196_s11 }
   0x7   :  { %p203_p3 = por %p202_p2, %p201_p1 }
   0x9   :  { %p204_p4 = pnand %p203_p3, %p197_p0 }
   0xb   :  { %207 = shalt.err (!%p204_p4)
}
   0xc   :  { %s255_s12 = smov 128   ;;  %s256_s13 = smov 8  }
   0xd   :  { %21 = dma.hbm_to_vmem [thread:$0]  %s304_s0, 256, %s16_s10, [#allocation3], %s255_s12, %s255_s12, %s256_s13  }
   0xe   :  { %s257_s16 = smov [#allocation5]  }
   0xf   :  { %s27_s17 = sshll.u32 %s257_s16, 4  ;;  %s28_s17 = int_to_ptr.vmem [resolvable:$true] %s27_s17 }
  0x10   :  { %s216_s18 = scalar_lea.vmem %s28_s17, 512  ;;  %p221_p6 = scmp.lt.s32.totalorder %s28_s17, %s28_s17 }
  0x11   :  { %p217_p5 = scmp.ne.s32.totalorder %s28_s17, %s216_s18  ;;  %p222_p7 = scmp.lt.s32.totalorder %s216_s18, %s216_s18 }
  0x13   :  { %p223_p8 = por %p222_p7, %p221_p6 }
  0x15   :  { %p224_p9 = pnand %p223_p8, %p217_p5 }
  0x17   :  { %227 = shalt.err (!%p224_p9)
}
  0x18   :  { %33 = dma.hbm_to_vmem [thread:$0]  %s305_s1, 512, %s28_s17, [#allocation6], %s255_s12, %s255_s12, %s256_s13  }
  0x19   :  { %248 = dma.done.wait [#allocation3], 256  }
  0x1a   :  { %249 = vsyncadd [#allocation3], 4294967040 }
  0x1b   :  { %250 = dma.done.wait [#allocation6], 512  }
  0x1c   :  { %251 = vsyncadd [#allocation6], 4294966784  ;;  %vm46_vm0 = vcmask 261120   ;;  %v45_v0 = vld [vmem:[#allocation5 + $0x18] sm:$0xff]  ;;  %v44_v1 = vld [vmem:[#allocation5 + $0x10] sm:$0xff]  ;;  %s258_s0 = smov [#allocation7]  }
  0x1d   :  { %172 = vmatprep.subr.msk.mxu0 %vm46_vm0, %v45_v0  ;;  %v40_v2 = vld [vmem:[#allocation2] sm:$0xff]  ;;  %v43_v3 = vld [vmem:[#allocation5 + $0x8] sm:$0xff]  ;;  %v42_v4 = vld [vmem:[#allocation5] sm:$0xff]  ;;  %s147_s1 = sshll.u32 %s258_s0, 4  ;;  %s148_s1 = int_to_ptr.vmem [resolvable:$true] %s147_s1 }
  0x1e   :  { %173 = vmatpush3.xpose.msk.msra.mxu0 %vm46_vm0, %v45_v0  ;;  %180 = vmatprep.mubr.msk.f32.mxu0 %vm46_vm0, %v40_v2  ;;  %v41_v5 = vld [vmem:[#allocation2 + $0x8] sm:$0xff]  ;;  %s228_s21 = scalar_lea.vmem %s148_s1, 256  ;;  %p233_p11 = scmp.lt.s32.totalorder %s148_s1, %s148_s1 }
  0x1f   :  { %174 = vmatprep.subr.msk.mxu0 %vm46_vm0, %v44_v1  ;;  %p229_p10 = scmp.ne.s32.totalorder %s148_s1, %s228_s21  ;;  %p234_p12 = scmp.lt.s32.totalorder %s228_s21, %s228_s21 }
  0x21   :  { %p235_p13 = por %p234_p12, %p233_p11 }
  0x22   :  { %175 = vmatpush3.xpose.msk.msra.mxu0 %vm46_vm0, %v44_v1 }
  0x23   :  { %176 = vmatprep.subr.msk.mxu0 %vm46_vm0, %v43_v3  ;;  %p236_p0 = pnand %p235_p13, %p229_p10 }
  0x26   :  { %177 = vmatpush3.xpose.msk.msra.mxu0 %vm46_vm0, %v43_v3 }
  0x27   :  { %178 = vmatprep.subr.msk.mxu0 %vm46_vm0, %v42_v4 }
  0x2a   :  { %179 = vmatpush3.xpose.msk.msra.mxu0 %vm46_vm0, %v42_v4 }
  0x2d   :  { %181 = vmatmul.mubr.msk.f32.vlgmr.msra.gmra.mxu0 %vm46_vm0, %v41_v5 }
  0xed   :  { %v182_v6 = vpop.f32.mrf.mxu0 }
  0xee   :  { %141 = vst.msk [vmem:[#allocation7 + $0x8] sm:$0xff] %vm46_vm0, %v182_v6 }
  0xef   :  { %v131_v7 = vpop.f32.mrf.mxu0 }
  0xf0   :  { %140 = vst.msk [vmem:[#allocation7] sm:$0xff] %vm46_vm0, %v131_v7 }
  0xf1   :  { %239 = shalt.err (!%p236_p0)
}
  0xf2   :  { %153 = dma.vmem_to_hbm [thread:$0]  %s148_s1, 256, %s306_s2, [#allocation4], %s255_s12, %s255_s12, %s256_s13  }
  0xf3   :  { %252 = dma.done.wait [#allocation4], 256  }
  0xf4   :  { %253 = vsyncadd [#allocation4], 4294967040 }
  0xf5   :  { %157 = vsyncpa [#allocation3], 1 }
  0xf6   :  { %158 = vsyncpa [#allocation6], 1 }
  0xf7   :  { %159 = vsyncpa [#allocation4], 1 }

</bundles_post_ra>
